<compile_context>
chip_gen: v7x
topology: tpu7x:2x2x1
jax: 0.10.0
libtpu: 0.0.40
codegen_flags: <defaults>
</compile_context>

<pallas_src>
import jax
import jax.numpy as jnp
from jax.experimental import pallas as pl
from jax.experimental.pallas import tpu as pltpu

_MAX_WIDTH = 1024                    # lane-dense last dim cap (multiple of 128)
_MAX_TILE_BYTES = 4 * 1024 * 1024    # <=4 MiB tiles: safe on v7x (64 MiB VMEM), fine on v5e/v6e
_FAST_PATH_ELEMS = 16384             # below this, a pure-XLA fusion beats kernel launch cost


def _mish_kernel(x_ref, o_ref):
    # Elementwise hot path: VPU mul/add, EUP exp + approx recip.
    x = x_ref[...].astype(jnp.float32)
    # tanh(softplus(x)) = tanh(log(1+e)) = u / (u + 2),  u = e*(e+2),  e = exp(min(x, 20)).
    # The clamp (a) matches PyTorch softplus threshold=20 to f32 precision
    # (u/(u+2) rounds to 1.0 there, so y == x) and (b) keeps intermediates
    # finite for garbage lanes in a ragged final block (stores are masked).
    # u = e*(e+2) avoids the (1+e)^2 - 1 cancellation in the negative tail.
    e = jnp.exp(jnp.minimum(x, 20.0))
    u = e * (e + 2.0)
    d = u + 2.0
    r = pl.reciprocal(d, approx=True)      # EUP approx recip (separate issue slot)
    r = r * (2.0 - d * r)                  # one Newton step on VPU -> ~f32 exact
    o_ref[...] = (x * (u * r)).astype(o_ref.dtype)


def _mish_jnp(x):
    # Pure-XLA path (tiny inputs) / reference; matches PyTorch mish semantics.
    xf = x.astype(jnp.float32)
    sp = jnp.where(xf > 20.0, xf, jnp.log1p(jnp.exp(jnp.minimum(xf, 20.0))))
    return (xf * jnp.tanh(sp)).astype(x.dtype)


def _round_up(a, m):
    return ((a + m - 1) // m) * m


def _pick_width(n):
    """Largest multiple of 128 that divides n, capped at _MAX_WIDTH (or None)."""
    for k in range(_MAX_WIDTH // 128, 0, -1):
        w = 128 * k
        if n % w == 0:
            return w
    return None


def _pick_tile_rows(rows, width, itemsize):
    if rows <= 16:
        return rows                        # single block == full array dims
    # Multiple of 8 (sublane rule), <= ~4 MiB, and >= 2 grid steps so both
    # v7x TensorCores (sharded via the "parallel" axis) stay busy.
    max_rows_by_bytes = max(8, (_MAX_TILE_BYTES // (width * itemsize)) // 8 * 8)
    half = _round_up(pl.cdiv(rows, 2), 8)
    return min(max_rows_by_bytes, half)


def _mish_2d(x2d, donate=False):
    rows, width = x2d.shape
    itemsize = x2d.dtype.itemsize
    tile_rows = _pick_tile_rows(rows, width, itemsize)
    grid_rows = pl.cdiv(rows, tile_rows)   # ragged final block -> masked stores
    nelem = rows * width

    return pl.pallas_call(
        _mish_kernel,
        out_shape=jax.ShapeDtypeStruct((rows, width), x2d.dtype),
        grid_spec=pltpu.PrefetchScalarGridSpec(
            num_scalar_prefetch=0,
            grid=(grid_rows,),
            in_specs=[pl.BlockSpec((tile_rows, width), lambda i: (i, 0))],
            out_specs=pl.BlockSpec((tile_rows, width), lambda i: (i, 0)),
        ),
        compiler_params=pltpu.CompilerParams(
            dimension_semantics=("parallel",),          # megacore-shardable row tiles
            vmem_limit_bytes=32 * 1024 * 1024,
        ),
        cost_estimate=pl.CostEstimate(
            flops=9 * nelem,
            transcendentals=2 * nelem,
            bytes_accessed=2 * nelem * itemsize,
        ),
        input_output_aliases=({0: 0} if donate else {}),
    )(x2d)


def mish(x, *, donate=False):
    """Mish forward pass: x * tanh(softplus(x)). Shape/dtype preserved."""
    orig_shape = x.shape
    n = x.size

    if n < _FAST_PATH_ELEMS:
        # pallas_call launch + reshape overhead dominates for tiny tensors.
        return _mish_jnp(x)

    width = _pick_width(n)
    if width is not None:
        # Common case: no pad, no trailing slice — reshape only.
        out2d = _mish_2d(x.reshape(n // width, width), donate=donate)
        return out2d.reshape(orig_shape)

    # Fallback (n not a multiple of 128): pad the flat tail by <128 elements.
    flat = x.reshape(-1)
    padded = _round_up(n, 128)
    flat = jnp.pad(flat, (0, padded - n))
    width = _pick_width(padded)
    out2d = _mish_2d(flat.reshape(padded // width, width), donate=False)
    return out2d.reshape(-1)[:n].reshape(orig_shape)


if __name__ == "__main__":
    key = jax.random.PRNGKey(0)
    k1, k2, k3 = jax.random.split(key, 3)

    # 1) Small NCL input matching the 1D model (fast path): batch=2, ch=4, seq=16.
    x_small = jax.random.normal(k1, (2, 4, 16), dtype=jnp.float32) * 3.0
    out_small = mish(x_small)
    jax.block_until_ready(out_small)
    assert out_small.shape == x_small.shape and out_small.dtype == x_small.dtype
    assert jnp.allclose(out_small, _mish_jnp(x_small), atol=1e-4, rtol=1e-4)

    # 2) Kernel path, no pad / no slice (n is a multiple of 128): (4, 8, 2048).
    x_big = jax.random.normal(k2, (4, 8, 2048), dtype=jnp.float32) * 4.0
    out_big = mish(x_big)
    jax.block_until_ready(out_big)
    assert out_big.shape == x_big.shape and out_big.dtype == x_big.dtype
    assert jnp.allclose(out_big, _mish_jnp(x_big), atol=1e-4, rtol=1e-4)

    # 3) Kernel path with tail pad + ragged final row block (n % 128 != 0).
    x_rag = jax.random.normal(k3, (3, 5, 2000), dtype=jnp.float32) * 4.0
    out_rag = mish(x_rag)
    jax.block_until_ready(out_rag)
    assert jnp.allclose(out_rag, _mish_jnp(x_rag), atol=1e-4, rtol=1e-4)

    # 4) Branch / extreme-value check (softplus threshold, deep negatives),
    #    tiled up so it exercises the kernel path too.
    x_edge = jnp.array([-100.0, -60.0, -17.5, -5.0, -1.0, 0.0, 1.0, 5.0,
                        19.9, 20.1, 25.0, 60.0, 100.0, 0.5, -0.5, 2.0],
                       dtype=jnp.float32)
    x_edge_big = jnp.tile(x_edge, 2048).reshape(2, 16, 1024)
    out_edge = mish(x_edge_big)
    jax.block_until_ready(out_edge)
    assert jnp.allclose(out_edge, _mish_jnp(x_edge_big), atol=1e-4, rtol=1e-4)

    print("KERNEL_OK")
</pallas_src>

<mosaic_0001>
module attributes {stable_mosaic.version = 11 : i64} {
  func.func @_mish_kernel(%arg0: i32, %arg1: memref<32x1024xf32, #tpu.memory_space<vmem>>, %arg2: memref<32x1024xf32, #tpu.memory_space<vmem>>) attributes {dimension_semantics = [#tpu.dimension_semantics<parallel>], iteration_bounds = array<i64: 2>, scalar_prefetch = 0 : i64, scratch_operands = 0 : i64, tpu.core_type = #tpu.core_type<tc>, window_params = [{transform_indices = @transform_0, window_bounds = array<i64: 32, 1024>}, {transform_indices = @transform_1, window_bounds = array<i64: 32, 1024>}]} {
    %c0 = arith.constant 0 : index
    %c0_0 = arith.constant 0 : index
    %0 = vector.load %arg1[%c0, %c0_0] : memref<32x1024xf32, #tpu.memory_space<vmem>>, vector<32x1024xf32>
    %cst = arith.constant 2.000000e+01 : f32
    %1 = vector.broadcast %cst : f32 to vector<32x1024xf32>
    %2 = arith.minimumf %0, %1 : vector<32x1024xf32>
    %3 = math.exp %2 : vector<32x1024xf32>
    %cst_1 = arith.constant 2.000000e+00 : f32
    %4 = vector.broadcast %cst_1 : f32 to vector<32x1024xf32>
    %5 = arith.addf %3, %4 : vector<32x1024xf32>
    %6 = arith.mulf %3, %5 : vector<32x1024xf32>
    %cst_2 = arith.constant 2.000000e+00 : f32
    %7 = vector.broadcast %cst_2 : f32 to vector<32x1024xf32>
    %8 = arith.addf %6, %7 : vector<32x1024xf32>
    %9 = tpu.reciprocal %8 {approx = true} : vector<32x1024xf32> -> vector<32x1024xf32>
    %10 = arith.mulf %8, %9 : vector<32x1024xf32>
    %cst_3 = arith.constant 2.000000e+00 : f32
    %11 = vector.broadcast %cst_3 : f32 to vector<32x1024xf32>
    %12 = arith.subf %11, %10 : vector<32x1024xf32>
    %13 = arith.mulf %9, %12 : vector<32x1024xf32>
    %14 = arith.mulf %6, %13 : vector<32x1024xf32>
    %15 = arith.mulf %0, %14 : vector<32x1024xf32>
    %c0_4 = arith.constant 0 : index
    %c0_5 = arith.constant 0 : index
    %16 = vector.load %arg2[%c0_4, %c0_5] : memref<32x1024xf32, #tpu.memory_space<vmem>>, vector<32x1024xf32>
    tpu.vector_store %arg2[%c0_4, %c0_5], %15 {strides = array<i32>} : memref<32x1024xf32, #tpu.memory_space<vmem>>, vector<32x1024xf32>,
    return
  }
  func.func @transform_0(%arg0: i32) -> (i32, i32) {
    %c0_i32 = arith.constant 0 : i32
    %c0_i32_0 = arith.constant 0 : i32
    return %arg0, %c0_i32 : i32, i32
  }
  func.func @transform_1(%arg0: i32) -> (i32, i32) {
    %c0_i32 = arith.constant 0 : i32
    %c0_i32_0 = arith.constant 0 : i32
    return %arg0, %c0_i32 : i32, i32
  }
}

</mosaic_0001>

<bundles_post_ra>
// kernel: tpu_custom_call.1
= control target key start
LH: loop header
LB: loop body
LE: loop exit
PB: predicated region body
PF: predicated region fallthrough
CT: control target
= control target key end

     0   :  { %6 = vsyncpa [#allocation3], 0  ;;  %s1599_s0 = inlined_call_operand.hbm [shape: f32[64,1024], index: 0, kind: input, shape index: {}]   ;;  %s1600_s1 = inlined_call_operand.hbm [shape: f32[64,1024], index: 1, kind: output, shape index: {}]  }
   0x1   :  { %8 = vsyncpa [#allocation3 + $0x1], 0 }
   0x2   :  { %9 = vsyncpa [#allocation4], 0 }
   0x3   :  { %11 = vsyncpa [#allocation4 + $0x1], 0  ;;  %s986_s6 = smov 0   ;;  %s988_s7 = smov 0  }
   0x4   :  { %s990_s8 = smov 0   ;;  %s992_s9 = smov 0  }
   0x5 LB: > { %s1007_s10 = sadd.s32 4294967295, %s968_s9   ;;  %s674_s11 = sadd.s32 4294967294, %s968_s9   ;;  %s968_s9 = sphi %s992_s9, %s1680_s9   ;;  %s964_s8 = sphi %s990_s8, %s1679_s8   ;;  %s960_s7 = sphi %s988_s7, %s1678_s7   ;;  %s956_s6 = sphi %s986_s6, %s1677_s6  }
   0x6   : > { %s1011_s12 = sadd.s32 1, %s968_s9   ;;  %s24_s13 = sadd.s32 1, %s964_s8 }
   0x7   : > { %s21_s14 = ssub.s32 %s968_s9, %s1011_s12  ;;  %p31_p0 = scmp.ne.s32.totalorder %s964_s8, %s960_s7 }
   0x8   : > { %p22_p1 = scmp.eq.s32.totalorder %s21_s14, 0  ;;  %p32_p2 = scmp.eq.s32.totalorder %s968_s9, 0 }
   0x9   : > { %p37_p3 = scmp.ne.s32.totalorder %s960_s7, %s956_s6  ;;  %p38_p4 = scmp.eq.s32.totalorder %s1007_s10, 0 }
   0xa   : > { %s1023_s15 = scalar_select %p22_p1, %s964_s8, %s24_s13  }
   0xb   : > { %p1025_p5 = por %p32_p2, %p31_p0  ;;  %p1029_p6 = por %p38_p4, %p37_p3 }
   0xc   : > { %p61_p7 = scmp.eq.s32.totalorder %s1007_s10, 1  ;;  %p67_p8 = scmp.eq.s32.totalorder %s674_s11, 1 }
   0xd   : > { %p706_p10 = scmp.lt.s32.totalorder %s968_s9, 2  ;;  %s87_s20 = sand.u32 1, %s964_s8  }
   0xe   : > { %p1036_p11 = por %p61_p7, %p31_p0  ;;  %p1040_p12 = por %p67_p8, %p37_p3 }
   0xf   : > { %s691_s21 = sshll.u32 %s968_s9, 12  ;;  %s677_s22 = sshll.u32 %s87_s20, 8 }
  0x10   : > { %s1622_s18 = scalar_select %p1036_p11, 1, 0 }
  0x11   : > { %s1623_s19 = scalar_select %p1040_p12, 1, 0 }
  0x12   : > { %s1049_s25 = scalar_lea.hbm %s1599_s0, %s691_s21  ;;  %s91_s26 = scalar_lea.vmem [#allocation2], %s677_s22 }
  0x13   : > { %s99_s27 = sshll.u32 %s91_s26, 4  ;;  %p1053_p13 = pnand %p706_p10, %p1025_p5  ;;  %s1057_s27 = int_to_ptr.vmem [resolvable:$true] %s99_s27 }
  0x14   : > { %s1059_s29 = scalar_lea.sflag [#allocation3], %s87_s20  ;;  %s872_s30 = scalar_lea.hbm %s1049_s25, 4096 }
  0x15   : > { %p873_p0 = scmp.ne.s32.totalorder %s1049_s25, %s872_s30  ;;  %p874_p1 = pneg %p1053_p13 }
  0x16   : > { %s877_s4 = scalar_lea.hbm %s1599_s0, 8192  ;;  %p878_p4 = scmp.lt.u32.totalorder %s1049_s25, %s1599_s0 }
  0x17   : > { %p875_p2 = pnand %p874_p1, %p873_p0  ;;  %p879_p5 = scmp.lt.u32.totalorder %s877_s4, %s872_s30 }
  0x18   : > { %p881_p8 = scmp.lt.u32.totalorder %s872_s30, %s1049_s25 }
  0x19   : > { %p876_p3 = pneg %p875_p2  ;;  %p880_p7 = por %p879_p5, %p878_p4 }
  0x1b   : > { %p882_p10 = por %p881_p8, %p880_p7 }
  0x1d   : > { %p883_p9 = pnand %p882_p10, %p876_p3 }
  0x1f   : > { %886 = shalt.err (!%p883_p9)
}
  0x20   : > { %s887_s13 = scalar_lea.vmem %s1057_s27, 4096  ;;  %s970_s14 = smov [#allocation2]  }
  0x21   : > { %p888_p0 = scmp.ne.s32.totalorder %s1057_s27, %s887_s13  ;;  %s892_s16 = sshll.u32 %s970_s14, 4  ;;  %s893_s16 = int_to_ptr.vmem [resolvable:$false] %s892_s16 }
  0x22   : > { %s894_s20 = scalar_lea.vmem %s893_s16, 8192  ;;  %p895_p11 = scmp.lt.s32.totalorder %s1057_s27, %s893_s16 }
  0x23   : > { %p890_p2 = pnand %p888_p0, %p874_p1  ;;  %p896_p4 = scmp.lt.s32.totalorder %s894_s20, %s887_s13 }
  0x25   : > { %p891_p12 = pneg %p890_p2  ;;  %p897_p5 = por %p896_p4, %p895_p11 }
  0x27   : > { %p898_p7 = pnand %p897_p5, %p891_p12 }
  0x29   : > { %901 = shalt.err (!%p898_p7)
}
  0x2a   : > { %s971_s21 = smov 1024   ;;  %s972_s22 = smov 64  }
  0x2b   : > { %701 = dma.hbm_to_vmem [thread:$0]  (!%p1053_p13), %s1049_s25, 4096, %s1057_s27, %s1059_s29, %s971_s21, %s971_s21, %s972_s22  }
  0x2c   : > { %p681_p9 = scmp.ge.s32.totalorder %s968_s9, 1  ;;  %p107_p1 = scmp.lt.s32.totalorder %s968_s9, 3 }
  0x2e   : > { %p108_p3 = pnand %p681_p9, %p107_p1 }
  0x30   : > { %111 = sbr.rel (%p108_p3) target bundleno = 184 (0xb8), region = 24 }
  0x37   : > { %s1090_s23 = sand.u32 1, %s960_s7  }
  0x38   : > { %s682_s24 = sshll.u32 %s1090_s23, 8  ;;  %s114_s26 = scalar_lea.sflag [#allocation3], %s1090_s23 }
  0x39   : > { %s1096_s30 = scalar_lea.vmem [#allocation2], %s682_s24 }
  0x3a   : > { %947 = dma.done.wait (%p1029_p6), %s114_s26, 4096  }
  0x3b   : > { %949 = vsyncadd (%p1029_p6), %s114_s26, 4294963200  ;;  %v1103_v0 = vld [vmem:[%s1096_s30] sm:$0xff]  ;;  %v1106_v1 = vld [vmem:[%s1096_s30 + $0x8] sm:$0xff]  ;;  %s1340_s17 = scalar_lea.vmem [#allocation5], %s682_s24  ;;  %s693_s25 = sshll.u32 %s1007_s10, 12 }
  0x3c   : > { %v1109_v2 = vld [vmem:[%s1096_s30 + $0x10] sm:$0xff]  ;;  %v170_v3 = vmin.f32 %v1103_v0, 20.0  ;;  %v171_v4 = vmin.f32 %v1106_v1, 20.0  ;;  %v1115_v6 = vld [vmem:[%s1096_s30 + $0x18] sm:$0xff]  ;;  %v1118_v7 = vld [vmem:[%s1096_s30 + $0x20] sm:$0xff]  ;;  %s601_s27 = sshll.u32 %s1340_s17, 4  ;;  %s1549_s10 = scalar_lea.hbm %s1600_s1, %s693_s25  ;;  %s1551_s27 = int_to_ptr.vmem [resolvable:$true] %s601_s27 }
  0x3d   : > { %v172_v5 = vmin.f32 %v1109_v2, 20.0  ;;  %v1121_v8 = vld [vmem:[%s1096_s30 + $0x28] sm:$0xff]  ;;  %v173_v9 = vmin.f32 %v1115_v6, 20.0  ;;  %v174_v10 = vmin.f32 %v1118_v7, 20.0  ;;  %v1127_v12 = vld [vmem:[%s1096_s30 + $0x30] sm:$0xff]  ;;  %v1130_v13 = vld [vmem:[%s1096_s30 + $0x38] sm:$0xff] }
  0x3e   : > { %v175_v11 = vmin.f32 %v1121_v8, 20.0  ;;  %v1133_v14 = vld [vmem:[%s1096_s30 + $0x40] sm:$0xff]  ;;  %v202_v15 = vmul.f32 1.442695, %v170_v3  ;;  %v204_v16 = vmul.f32 1.442695, %v171_v4 }
  0x3f   : > { %v206_v17 = vmul.f32 1.442695, %v172_v5  ;;  %v208_v18 = vmul.f32 1.442695, %v173_v9  ;;  %v210_v19 = vmul.f32 1.442695, %v174_v10 }
  0x40   : > { %v212_v20 = vmul.f32 1.442695, %v175_v11  ;;  %744 = vpow2.f32 %v202_v15  ;;  %v176_v21 = vmin.f32 %v1127_v12, 20.0  ;;  %v177_v22 = vmin.f32 %v1130_v13, 20.0  ;;  %v1139_v24 = vld [vmem:[%s1096_s30 + $0x48] sm:$0xff]  ;;  %v1142_v25 = vld [vmem:[%s1096_s30 + $0x50] sm:$0xff] }
  0x41   : > { %v178_v23 = vmin.f32 %v1133_v14, 20.0  ;;  %v1145_v26 = vld [vmem:[%s1096_s30 + $0x58] sm:$0xff]  ;;  %746 = vpow2.f32 %v204_v16  ;;  %v179_v27 = vmin.f32 %v1139_v24, 20.0  ;;  %v180_v28 = vmin.f32 %v1142_v25, 20.0  ;;  %v1151_v30 = vld [vmem:[%s1096_s30 + $0x60] sm:$0xff]  ;;  %v1154_v31 = vld [vmem:[%s1096_s30 + $0x68] sm:$0xff] }
  0x42   : > { %v181_v29 = vmin.f32 %v1145_v26, 20.0  ;;  %1625 = vst [vmem:[#allocation8_spill] sm:$0xff] %v1151_v30  ;;  %1626 = vst [vmem:[#allocation9_spill] sm:$0xff] %v1154_v31  ;;  %v1157_v32 = vld [vmem:[%s1096_s30 + $0x70] sm:$0xff]  ;;  %748 = vpow2.f32 %v206_v17  ;;  %v214_v33 = vmul.f32 1.442695, %v176_v21 }
  0x43   : > { %1627 = vst [vmem:[#allocation10_spill] sm:$0xff] %v1157_v32  ;;  %v216_v34 = vmul.f32 1.442695, %v177_v22  ;;  %v218_v35 = vmul.f32 1.442695, %v178_v23  ;;  %750 = vpow2.f32 %v208_v18  ;;  %v182_v39 = vmin.f32 %v1151_v30, 20.0 }
  0x44   : > { %v220_v36 = vmul.f32 1.442695, %v179_v27  ;;  %v222_v37 = vmul.f32 1.442695, %v180_v28  ;;  %v224_v38 = vmul.f32 1.442695, %v181_v29  ;;  %752 = vpow2.f32 %v210_v19 }
  0x45   : > { %v183_v40 = vmin.f32 %v1154_v31, 20.0  ;;  %v184_v41 = vmin.f32 %v1157_v32, 20.0  ;;  %v1163_v42 = vld [vmem:[%s1096_s30 + $0x78] sm:$0xff]  ;;  %v1166_v43 = vld [vmem:[%s1096_s30 + $0x80] sm:$0xff]  ;;  %v1169_v44 = vld [vmem:[%s1096_s30 + $0x88] sm:$0xff]  ;;  %754 = vpow2.f32 %v212_v20  ;;  %s587_s2 = scalar_lea.sflag [#allocation4], %s1090_s23 }
  0x46   : > { %1628 = vst [vmem:[#allocation11_spill] sm:$0xff] %v1163_v42  ;;  %1629 = vst [vmem:[#allocation12_spill] sm:$0xff] %v1166_v43  ;;  %v185_v45 = vmin.f32 %v1163_v42, 20.0  ;;  %v186_v46 = vmin.f32 %v1166_v43, 20.0  ;;  %v187_v47 = vmin.f32 %v1169_v44, 20.0  ;;  %v1175_v48 = vld [vmem:[%s1096_s30 + $0x90] sm:$0xff]  ;;  %756 = vpow2.f32 %v214_v33 }
  0x47   : > { %1630 = vst [vmem:[#allocation13_spill] sm:$0xff] %v1169_v44  ;;  %1631 = vst [vmem:[#allocation14_spill] sm:$0xff] %v1175_v48  ;;  %v1178_v49 = vld [vmem:[%s1096_s30 + $0x98] sm:$0xff]  ;;  %v1181_v50 = vld [vmem:[%s1096_s30 + $0xa0] sm:$0xff]  ;;  %v226_v51 = vmul.f32 1.442695, %v182_v39  ;;  %758 = vpow2.f32 %v216_v34 }
  0x48   : > { %1632 = vst [vmem:[#allocation15_spill] sm:$0xff] %v1178_v49  ;;  %1633 = vst [vmem:[#allocation16_spill] sm:$0xff] %v1181_v50  ;;  %v228_v52 = vmul.f32 1.442695, %v183_v40  ;;  %v230_v53 = vmul.f32 1.442695, %v184_v41  ;;  %760 = vpow2.f32 %v218_v35 }
  0x49   : > { %v232_v54 = vmul.f32 1.442695, %v185_v45  ;;  %v234_v55 = vmul.f32 1.442695, %v186_v46  ;;  %v1183_v56 = vmul.f32 1.442695, %v187_v47  ;;  %762 = vpow2.f32 %v220_v36 }
  0x4a   : > { %v188_v57 = vmin.f32 %v1175_v48, 20.0  ;;  %v189_v58 = vmin.f32 %v1178_v49, 20.0  ;;  %v190_v59 = vmin.f32 %v1181_v50, 20.0  ;;  %v1189_v60 = vld [vmem:[%s1096_s30 + $0xa8] sm:$0xff]  ;;  %v1192_v61 = vld [vmem:[%s1096_s30 + $0xb0] sm:$0xff]  ;;  %v1195_v62 = vld [vmem:[%s1096_s30 + $0xb8] sm:$0xff]  ;;  %v745_v10 = vpop.eup %744  ;;  %764 = vpow2.f32 %v222_v37 }
  0x4b   : > { %1634 = vst [vmem:[#allocation17_spill] sm:$0xff] %v1189_v60  ;;  %1635 = vst [vmem:[#allocation18_spill] sm:$0xff] %v1192_v61  ;;  %v191_v63 = vmin.f32 %v1189_v60, 20.0  ;;  %v192_v3 = vmin.f32 %v1192_v61, 20.0  ;;  %v193_v4 = vmin.f32 %v1195_v62, 20.0  ;;  %v1201_v5 = vld [vmem:[%s1096_s30 + $0xc0] sm:$0xff]  ;;  %v747_v17 = vpop.eup %746  ;;  %766 = vpow2.f32 %v224_v38 }
  0x4c   : > { %1636 = vst [vmem:[#allocation19_spill] sm:$0xff] %v1195_v62  ;;  %1637 = vst [vmem:[#allocation20_spill] sm:$0xff] %v1201_v5  ;;  %v1204_v9 = vld [vmem:[%s1096_s30 + $0xc8] sm:$0xff]  ;;  %v1206_v11 = vmul.f32 1.442695, %v188_v57  ;;  %v266_v18 = vadd.f32 2.0, %v745_v10  ;;  %v749_v21 = vpop.eup %748  ;;  %768 = vpow2.f32 %v226_v51 }
  0x4d   : > { %1638 = vst [vmem:[#allocation21_spill] sm:$0xff] %v1204_v9  ;;  %v1208_v15 = vmul.f32 1.442695, %v189_v58  ;;  %v1210_v16 = vmul.f32 1.442695, %v190_v59  ;;  %v267_v22 = vadd.f32 2.0, %v747_v17  ;;  %v751_v28 = vpop.eup %750  ;;  %770 = vpow2.f32 %v228_v52 }
  0x4e   : > { %1639 = vst [vmem:[#allocation22_spill] sm:$0xff] %v1206_v11  ;;  %v1212_v19 = vmul.f32 1.442695, %v191_v63  ;;  %v1214_v20 = vmul.f32 1.442695, %v192_v3  ;;  %v194_v27 = vmin.f32 %v1201_v5, 20.0  ;;  %v1219_v29 = vmul.f32 %v745_v10, %v266_v18  ;;  %v753_v35 = vpop.eup %752 }
  0x4f   : > { %1640 = vst [vmem:[#allocation23_spill] sm:$0xff] %v1208_v15  ;;  %1641 = vst [vmem:[#allocation24_spill] sm:$0xff] %v1210_v16  ;;  %v1216_v23 = vmul.f32 1.442695, %v193_v4  ;;  %v268_v33 = vadd.f32 2.0, %v749_v21  ;;  %v1222_v36 = vmul.f32 %v747_v17, %v267_v22  ;;  %v269_v37 = vadd.f32 2.0, %v751_v28  ;;  %v755_v39 = vpop.eup %754 }
  0x50   : > { %1642 = vst [vmem:[#allocation25_spill] sm:$0xff] %v1212_v19  ;;  %1643 = vst [vmem:[#allocation26_spill] sm:$0xff] %v1214_v20  ;;  %772 = vpow2.f32 %v230_v53  ;;  %v1224_v38 = vmul.f32 1.442695, %v194_v27  ;;  %v1227_v40 = vadd.f32 2.0, %v1219_v29  ;;  %v270_v45 = vadd.f32 2.0, %v753_v35  ;;  %v757_v46 = vpop.eup %756 }
  0x51   : > { %1644 = vst [vmem:[#allocation27_spill] sm:$0xff] %v1216_v23  ;;  %v1229_v41 = vmul.f32 %v749_v21, %v268_v33  ;;  %774 = vpow2.f32 %v232_v54  ;;  %v1232_v47 = vadd.f32 2.0, %v1222_v36  ;;  %v1234_v51 = vmul.f32 %v751_v28, %v269_v37  ;;  %v759_v57 = vpop.eup %758  ;;  %s902_s3 = scalar_lea.vmem %s1551_s27, 4096  ;;  %p1674_p11 = scmp.ne.s32.totalorder %s1622_s18, 0 }
  0x52   : > { %1645 = vst [vmem:[#allocation28_spill] sm:$0xff] %v1224_v38  ;;  %v271_v52 = vadd.f32 2.0, %v755_v39  ;;  %776 = vpow2.f32 %v234_v55  ;;  %v1240_v58 = vmul.f32 %v753_v35, %v270_v45  ;;  %v272_v59 = vadd.f32 2.0, %v757_v46  ;;  %v761_v63 = vpop.eup %760  ;;  %p903_p6 = scmp.ne.s32.totalorder %s1551_s27, %s902_s3  ;;  %s973_s4 = smov [#allocation5]  }
  0x53   : > { %778 = vrcp.f32 %v1227_v40  ;;  %v1238_v53 = vadd.f32 2.0, %v1229_v41  ;;  %v1244_v54 = vadd.f32 2.0, %v1234_v51  ;;  %v273_v4 = vadd.f32 2.0, %v759_v57  ;;  %v763_v10 = vpop.eup %762  ;;  %s906_s5 = sshll.u32 %s973_s4, 4  ;;  %s907_s5 = int_to_ptr.vmem [resolvable:$false] %s906_s5 }
  0x54   : > { %780 = vrcp.f32 %v1232_v47  ;;  %v1246_v3 = vmul.f32 %v755_v39, %v271_v52  ;;  %v1250_v55 = vadd.f32 2.0, %v1240_v58  ;;  %v1252_v17 = vmul.f32 %v757_v46, %v272_v59  ;;  %v765_v21 = vpop.eup %764  ;;  %p904_p12 = pnand %p903_p6, %p1674_p11  ;;  %s908_s11 = scalar_lea.vmem %s907_s5, 8192 }
  0x55   : > { %782 = vrcp.f32 %v1238_v53  ;;  %v274_v18 = vadd.f32 2.0, %v761_v63  ;;  %v1258_v27 = vmul.f32 %v759_v57, %v273_v4  ;;  %v275_v28 = vadd.f32 2.0, %v763_v10  ;;  %v767_v33 = vpop.eup %766  ;;  %p909_p8 = scmp.lt.s32.totalorder %s1551_s27, %s907_s5  ;;  %p910_p10 = scmp.lt.s32.totalorder %s908_s11, %s902_s3 }
  0x56   : > { %784 = vrcp.f32 %v1244_v54  ;;  %v1256_v22 = vadd.f32 2.0, %v1246_v3  ;;  %v1262_v35 = vadd.f32 2.0, %v1252_v17  ;;  %v276_v39 = vadd.f32 2.0, %v765_v21  ;;  %v769_v45 = vpop.eup %768  ;;  %p905_p13 = pneg %p904_p12 }
  0x57   : > { %786 = vrcp.f32 %v1250_v55  ;;  %v1264_v37 = vmul.f32 %v761_v63, %v274_v18  ;;  %v1268_v46 = vadd.f32 2.0, %v1258_v27  ;;  %v1270_v52 = vmul.f32 %v763_v10, %v275_v28  ;;  %v771_v59 = vpop.eup %770  ;;  %p911_p0 = por %p910_p10, %p909_p8 }
  0x58   : > { %788 = vrcp.f32 %v1256_v22  ;;  %v277_v57 = vadd.f32 2.0, %v767_v33  ;;  %v1276_v34 = vmul.f32 %v765_v21, %v276_v39  ;;  %v278_v63 = vadd.f32 2.0, %v769_v45 }
  0x59   : > { %790 = vrcp.f32 %v1262_v35  ;;  %v1274_v4 = vadd.f32 2.0, %v1264_v37  ;;  %v1280_v5 = vadd.f32 2.0, %v1270_v52  ;;  %v279_v10 = vadd.f32 2.0, %v771_v59  ;;  %p912_p2 = pnand %p911_p0, %p905_p13 }
  0x5a   : > { %v773_v18 = vpop.eup %772  ;;  %792 = vrcp.f32 %v1268_v46  ;;  %v1282_v62 = vmul.f32 %v767_v33, %v277_v57  ;;  %v1286_v61 = vadd.f32 2.0, %v1276_v34  ;;  %v1288_v60 = vmul.f32 %v769_v45, %v278_v63 }
  0x5b   : > { %v775_v28 = vpop.eup %774  ;;  %794 = vrcp.f32 %v1274_v4  ;;  %v280_v21 = vadd.f32 2.0, %v773_v18  ;;  %v1294_v49 = vmul.f32 %v771_v59, %v279_v10 }
  0x5c   : > { %v777_v39 = vpop.eup %776  ;;  %796 = vrcp.f32 %v1280_v5  ;;  %v1292_v50 = vadd.f32 2.0, %v1282_v62  ;;  %v281_v33 = vadd.f32 2.0, %v775_v28  ;;  %v1298_v48 = vadd.f32 2.0, %v1288_v60 }
  0x5d   : > { %v779_v57 = vpop.eup %778  ;;  %798 = vrcp.f32 %v1286_v61  ;;  %v1300_v44 = vmul.f32 %v773_v18, %v280_v21  ;;  %v282_v45 = vadd.f32 2.0, %v777_v39  ;;  %v1305_v43 = vadd.f32 2.0, %v1294_v49 }
  0x5e   : > { %v781_v63 = vpop.eup %780  ;;  %v394_v38 = vmul.f32 %v779_v57, %v1227_v40  ;;  %800 = vrcp.f32 %v1292_v50  ;;  %v1307_v59 = vmul.f32 %v775_v28, %v281_v33 }
  0x5f   : > { %1646 = vst [vmem:[#allocation29_spill] sm:$0xff] %v1300_v44  ;;  %v783_v10 = vpop.eup %782  ;;  %v395_v23 = vmul.f32 %v781_v63, %v1232_v47  ;;  %802 = vrcp.f32 %v1298_v48  ;;  %v1312_v20 = vadd.f32 2.0, %v1300_v44  ;;  %v1314_v18 = vmul.f32 %v777_v39, %v282_v45 }
  0x60   : > { %1647 = vst [vmem:[#allocation30_spill] sm:$0xff] %v1307_v59  ;;  %v785_v21 = vpop.eup %784  ;;  %v426_v19 = vsub.f32 2.0, %v394_v38  ;;  %v396_v40 = vmul.f32 %v783_v10, %v1238_v53  ;;  %804 = vrcp.f32 %v1305_v43  ;;  %v1319_v42 = vadd.f32 2.0, %v1307_v59 }
  0x61   : > { %1648 = vst [vmem:[#allocation31_spill] sm:$0xff] %v1314_v18  ;;  %v787_v28 = vpop.eup %786  ;;  %v427_v33 = vsub.f32 2.0, %v395_v23  ;;  %v397_v47 = vmul.f32 %v785_v21, %v1244_v54  ;;  %806 = vrcp.f32 %v1312_v20  ;;  %v1324_v16 = vadd.f32 2.0, %v1314_v18 }
  0x62   : > { %v789_v39 = vpop.eup %788  ;;  %v458_v45 = vmul.f32 %v779_v57, %v426_v19  ;;  %v428_v32 = vsub.f32 2.0, %v396_v40  ;;  %v398_v38 = vmul.f32 %v787_v28, %v1250_v55  ;;  %808 = vrcp.f32 %v1319_v42 }
  0x63   : > { %v791_v53 = vpop.eup %790  ;;  %v459_v9 = vmul.f32 %v781_v63, %v427_v33  ;;  %v429_v15 = vsub.f32 2.0, %v397_v47  ;;  %v399_v59 = vmul.f32 %v789_v39, %v1256_v22  ;;  %810 = vrcp.f32 %v1324_v16 }
  0x64   : > { %v793_v23 = vpop.eup %792  ;;  %v490_v54 = vmul.f32 %v458_v45, %v1219_v29  ;;  %v460_v31 = vmul.f32 %v783_v10, %v428_v32  ;;  %v430_v18 = vsub.f32 2.0, %v398_v38  ;;  %v400_v11 = vmul.f32 %v791_v53, %v1262_v35 }
  0x65   : > { %v795_v19 = vpop.eup %794  ;;  %v491_v55 = vmul.f32 %v459_v9, %v1222_v36  ;;  %v461_v57 = vmul.f32 %v785_v21, %v429_v15  ;;  %v431_v40 = vsub.f32 2.0, %v399_v59  ;;  %v401_v63 = vmul.f32 %v793_v23, %v1268_v46 }
  0x66   : > { %v797_v33 = vpop.eup %796  ;;  %v522_v22 = vmul.f32 %v490_v54, %v1103_v0  ;;  %v492_v47 = vmul.f32 %v460_v31, %v1229_v41  ;;  %v462_v44 = vmul.f32 %v787_v28, %v430_v18  ;;  %v432_v30 = vsub.f32 2.0, %v400_v11 }
  0x67   : > { %v799_v29 = vpop.eup %798  ;;  %v523_v32 = vmul.f32 %v491_v55, %v1106_v1  ;;  %v493_v35 = vmul.f32 %v461_v57, %v1234_v51  ;;  %v463_v10 = vmul.f32 %v789_v39, %v431_v40  ;;  %v433_v45 = vsub.f32 2.0, %v401_v63 }
  0x68   : > { %v801_v38 = vpop.eup %800  ;;  %554 = vst [vmem:[%s1340_s17] sm:$0xff] %v522_v22  ;;  %v524_v0 = vmul.f32 %v492_v47, %v1109_v2  ;;  %v494_v31 = vmul.f32 %v462_v44, %v1240_v58  ;;  %v464_v9 = vmul.f32 %v791_v53, %v432_v30  ;;  %v402_v1 = vmul.f32 %v795_v19, %v1274_v4 }
  0x69   : > { %v803_v11 = vpop.eup %802  ;;  %555 = vst [vmem:[%s1340_s17 + $0x8] sm:$0xff] %v523_v32  ;;  %v525_v15 = vmul.f32 %v493_v35, %v1115_v6  ;;  %v495_v36 = vmul.f32 %v463_v10, %v1246_v3  ;;  %v465_v41 = vmul.f32 %v793_v23, %v433_v45  ;;  %v403_v51 = vmul.f32 %v797_v33, %v1280_v5  ;;  %v1652_v45 = vld [vmem:[#allocation9_spill] sm:$0xff] }
  0x6a   : > { %v805_v46 = vpop.eup %804  ;;  %556 = vst [vmem:[%s1340_s17 + $0x10] sm:$0xff] %v524_v0  ;;  %v526_v2 = vmul.f32 %v494_v31, %v1118_v7  ;;  %v496_v44 = vmul.f32 %v464_v9, %v1252_v17  ;;  %v434_v30 = vsub.f32 2.0, %v402_v1  ;;  %v404_v58 = vmul.f32 %v799_v29, %v1286_v61  ;;  %v1654_v31 = vld [vmem:[#allocation23_spill] sm:$0xff]  ;;  %v1655_v9 = vld [vmem:[#allocation21_spill] sm:$0xff] }
  0x6b   : > { %v807_v4 = vpop.eup %806  ;;  %557 = vst [vmem:[%s1340_s17 + $0x18] sm:$0xff] %v525_v15  ;;  %v527_v6 = vmul.f32 %v495_v36, %v1121_v8  ;;  %v497_v3 = vmul.f32 %v465_v41, %v1258_v27  ;;  %v435_v59 = vsub.f32 2.0, %v403_v51  ;;  %v405_v5 = vmul.f32 %v801_v38, %v1292_v50  ;;  %v1402_v15 = vld [vmem:[%s1096_s30 + $0xe8] sm:$0xff]  ;;  %v1657_v36 = vld [vmem:[#allocation10_spill] sm:$0xff] }
  0x6c   : > { %v809_v18 = vpop.eup %808  ;;  %558 = vst [vmem:[%s1340_s17 + $0x20] sm:$0xff] %v526_v2  ;;  %v528_v7 = vmul.f32 %v496_v44, %v1127_v12  ;;  %v466_v17 = vmul.f32 %v795_v19, %v434_v30  ;;  %v436_v21 = vsub.f32 2.0, %v404_v58  ;;  %v406_v28 = vmul.f32 %v803_v11, %v1298_v48  ;;  %v1409_v44 = vld [vmem:[%s1096_s30 + $0xf0] sm:$0xff]  ;;  %v1659_v30 = vld [vmem:[#allocation11_spill] sm:$0xff] }
  0x6d   : > { %v811_v61 = vpop.eup %810  ;;  %559 = vst [vmem:[%s1340_s17 + $0x28] sm:$0xff] %v527_v6  ;;  %v529_v39 = vmul.f32 %v497_v3, %v1130_v13  ;;  %v467_v8 = vmul.f32 %v797_v33, %v435_v59  ;;  %v437_v53 = vsub.f32 2.0, %v405_v5  ;;  %v407_v27 = vmul.f32 %v805_v46, %v1305_v43  ;;  %v1417_v59 = vld [vmem:[%s1096_s30 + $0xf8] sm:$0xff] }
  0x6e   : > { %560 = vst [vmem:[%s1340_s17 + $0x30] sm:$0xff] %v528_v7  ;;  %v498_v50 = vmul.f32 %v466_v17, %v1264_v37  ;;  %v468_v23 = vmul.f32 %v799_v29, %v436_v21  ;;  %v438_v54 = vsub.f32 2.0, %v406_v28  ;;  %v408_v12 = vmul.f32 %v807_v4, %v1312_v20  ;;  %v1383_v29 = vld [vmem:[%s1096_s30 + $0xd0] sm:$0xff]  ;;  %v1661_v5 = vld [vmem:[#allocation31_spill] sm:$0xff] }
  0x6f   : > { %561 = vst [vmem:[%s1340_s17 + $0x38] sm:$0xff] %v529_v39  ;;  %v499_v19 = vmul.f32 %v467_v8, %v1270_v52  ;;  %v469_v48 = vmul.f32 %v801_v38, %v437_v53  ;;  %v439_v55 = vsub.f32 2.0, %v407_v27  ;;  %v409_v13 = vmul.f32 %v809_v18, %v1319_v42  ;;  %v1662_v7 = vld [vmem:[#allocation26_spill] sm:$0xff]  ;;  %v1663_v28 = vld [vmem:[#allocation27_spill] sm:$0xff]  ;;  %v1664_v8 = vld [vmem:[#allocation12_spill] sm:$0xff] }
  0x70   : > { %v530_v57 = vmul.f32 %v498_v50, %v1133_v14  ;;  %v500_v43 = vmul.f32 %v468_v23, %v1276_v34  ;;  %v470_v40 = vmul.f32 %v803_v11, %v438_v54  ;;  %v440_v37 = vsub.f32 2.0, %v408_v12  ;;  %v1665_v27 = vld [vmem:[#allocation28_spill] sm:$0xff] }
  0x71   : > { %v531_v63 = vmul.f32 %v499_v19, %v1139_v24  ;;  %v501_v20 = vmul.f32 %v469_v48, %v1282_v62  ;;  %v471_v33 = vmul.f32 %v805_v46, %v439_v55  ;;  %v441_v22 = vsub.f32 2.0, %v409_v13  ;;  %v1658_v46 = vld [vmem:[#allocation24_spill] sm:$0xff] }
  0x72   : > { %562 = vst [vmem:[%s1340_s17 + $0x40] sm:$0xff] %v530_v57  ;;  %v532_v52 = vmul.f32 %v500_v43, %v1142_v25  ;;  %v502_v42 = vmul.f32 %v470_v40, %v1288_v60  ;;  %v472_v14 = vmul.f32 %v807_v4, %v440_v37  ;;  %v410_v34 = vmul.f32 %v811_v61, %v1324_v16  ;;  %v1649_v25 = vld [vmem:[#allocation8_spill] sm:$0xff]  ;;  %v1650_v60 = vld [vmem:[#allocation29_spill] sm:$0xff]  ;;  %v1651_v16 = vld [vmem:[#allocation22_spill] sm:$0xff] }
  0x73   : > { %563 = vst [vmem:[%s1340_s17 + $0x48] sm:$0xff] %v531_v63  ;;  %v533_v47 = vmul.f32 %v501_v20, %v1145_v26  ;;  %v503_v24 = vmul.f32 %v471_v33, %v1294_v49  ;;  %v473_v62 = vmul.f32 %v809_v18, %v441_v22  ;;  %812 = vpow2.f32 %v1183_v56  ;;  %v1390_v26 = vld [vmem:[%s1096_s30 + $0xd8] sm:$0xff]  ;;  %v1393_v49 = vld [vmem:[%s1096_s30 + $0xe0] sm:$0xff]  ;;  %v1653_v56 = vld [vmem:[#allocation30_spill] sm:$0xff] }
  0x74   : > { %564 = vst [vmem:[%s1340_s17 + $0x50] sm:$0xff] %v532_v52  ;;  %v534_v32 = vmul.f32 %v502_v42, %v1649_v25  ;;  %v504_v35 = vmul.f32 %v472_v14, %v1650_v60  ;;  %v442_v10 = vsub.f32 2.0, %v410_v34  ;;  %814 = vpow2.f32 %v1651_v16  ;;  %v1660_v4 = vld [vmem:[#allocation25_spill] sm:$0xff] }
  0x75   : > { %565 = vst [vmem:[%s1340_s17 + $0x58] sm:$0xff] %v533_v47  ;;  %v535_v38 = vmul.f32 %v503_v24, %v1652_v45  ;;  %v505_v0 = vmul.f32 %v473_v62, %v1653_v56  ;;  %816 = vpow2.f32 %v1654_v31  ;;  %v1656_v1 = vmin.f32 %v1655_v9, 20.0 }
  0x76   : > { %566 = vst [vmem:[%s1340_s17 + $0x60] sm:$0xff] %v534_v32  ;;  %v536_v41 = vmul.f32 %v504_v35, %v1657_v36  ;;  %v474_v51 = vmul.f32 %v811_v61, %v442_v10  ;;  %818 = vpow2.f32 %v1658_v46  ;;  %v196_v2 = vmin.f32 %v1383_v29, 20.0 }
  0x77   : > { %v252_v11 = vmul.f32 1.442695, %v1656_v1  ;;  %567 = vst [vmem:[%s1340_s17 + $0x68] sm:$0xff] %v535_v38  ;;  %v537_v58 = vmul.f32 %v505_v0, %v1659_v30  ;;  %820 = vpow2.f32 %v1660_v4  ;;  %v197_v6 = vmin.f32 %v1390_v26, 20.0 }
  0x78   : > { %v198_v3 = vmin.f32 %v1393_v49, 20.0  ;;  %568 = vst [vmem:[%s1340_s17 + $0x70] sm:$0xff] %v536_v41  ;;  %v506_v18 = vmul.f32 %v474_v51, %v1661_v5  ;;  %822 = vpow2.f32 %v1662_v7  ;;  %v254_v17 = vmul.f32 1.442695, %v196_v2 }
  0x79   : > { %v199_v21 = vmin.f32 %v1402_v15, 20.0  ;;  %569 = vst [vmem:[%s1340_s17 + $0x78] sm:$0xff] %v537_v58  ;;  %824 = vpow2.f32 %v1663_v28  ;;  %v256_v61 = vmul.f32 1.442695, %v197_v6  ;;  %v200_v39 = vmin.f32 %v1409_v44, 20.0 }
  0x7a   : > { %v538_v53 = vmul.f32 %v506_v18, %v1664_v8  ;;  %826 = vpow2.f32 %v1665_v27  ;;  %v258_v50 = vmul.f32 1.442695, %v198_v3  ;;  %v201_v23 = vmin.f32 %v1417_v59, 20.0 }
  0x7b   : > { %828 = vpow2.f32 %v252_v11  ;;  %v260_v54 = vmul.f32 1.442695, %v199_v21  ;;  %v262_v12 = vmul.f32 1.442695, %v200_v39 }
  0x7c   : > { %570 = vst [vmem:[%s1340_s17 + $0x80] sm:$0xff] %v538_v53  ;;  %830 = vpow2.f32 %v254_v17  ;;  %v264_v48 = vmul.f32 1.442695, %v201_v23 }
  0x7d   : > { %v813_v19 = vpop.eup %812  ;;  %832 = vpow2.f32 %v256_v61 }
  0x7e   : > { %v815_v55 = vpop.eup %814  ;;  %v283_v13 = vadd.f32 2.0, %v813_v19  ;;  %834 = vpow2.f32 %v258_v50 }
  0x7f   : > { %v817_v57 = vpop.eup %816  ;;  %v284_v43 = vadd.f32 2.0, %v815_v55  ;;  %836 = vpow2.f32 %v260_v54 }
  0x80   : > { %v819_v40 = vpop.eup %818  ;;  %v1430_v37 = vmul.f32 %v813_v19, %v283_v13  ;;  %v285_v63 = vadd.f32 2.0, %v817_v57  ;;  %838 = vpow2.f32 %v262_v12 }
  0x81   : > { %v821_v20 = vpop.eup %820  ;;  %v1432_v33 = vmul.f32 %v815_v55, %v284_v43  ;;  %v286_v22 = vadd.f32 2.0, %v819_v40  ;;  %840 = vpow2.f32 %v264_v48 }
  0x82   : > { %v823_v52 = vpop.eup %822  ;;  %v347_v42 = vadd.f32 2.0, %v1430_v37  ;;  %v1435_v14 = vmul.f32 %v817_v57, %v285_v63  ;;  %v287_v34 = vadd.f32 2.0, %v821_v20 }
  0x83   : > { %v825_v47 = vpop.eup %824  ;;  %v348_v24 = vadd.f32 2.0, %v1432_v33  ;;  %v1438_v62 = vmul.f32 %v819_v40, %v286_v22  ;;  %v288_v25 = vadd.f32 2.0, %v823_v52 }
  0x84   : > { %v827_v32 = vpop.eup %826  ;;  %842 = vrcp.f32 %v347_v42  ;;  %v349_v60 = vadd.f32 2.0, %v1435_v14  ;;  %v1441_v35 = vmul.f32 %v821_v20, %v287_v34  ;;  %v289_v10 = vadd.f32 2.0, %v825_v47 }
  0x85   : > { %v829_v16 = vpop.eup %828  ;;  %844 = vrcp.f32 %v348_v24  ;;  %v350_v45 = vadd.f32 2.0, %v1438_v62  ;;  %v1444_v38 = vmul.f32 %v823_v52, %v288_v25  ;;  %v290_v56 = vadd.f32 2.0, %v827_v32 }
  0x86   : > { %v831_v0 = vpop.eup %830  ;;  %846 = vrcp.f32 %v349_v60  ;;  %v351_v31 = vadd.f32 2.0, %v1441_v35  ;;  %v1447_v1 = vmul.f32 %v825_v47, %v289_v10  ;;  %v291_v11 = vadd.f32 2.0, %v829_v16 }
  0x87   : > { %v833_v36 = vpop.eup %832  ;;  %848 = vrcp.f32 %v350_v45  ;;  %v352_v41 = vadd.f32 2.0, %v1444_v38  ;;  %v1450_v51 = vmul.f32 %v827_v32, %v290_v56  ;;  %v292_v46 = vadd.f32 2.0, %v831_v0 }
  0x88   : > { %v835_v2 = vpop.eup %834  ;;  %850 = vrcp.f32 %v351_v31  ;;  %v353_v30 = vadd.f32 2.0, %v1447_v1  ;;  %v1453_v58 = vmul.f32 %v829_v16, %v291_v11  ;;  %v293_v4 = vadd.f32 2.0, %v833_v36 }
  0x89   : > { %v837_v6 = vpop.eup %836  ;;  %852 = vrcp.f32 %v352_v41  ;;  %v354_v3 = vadd.f32 2.0, %v1450_v51  ;;  %v1456_v5 = vmul.f32 %v831_v0, %v292_v46  ;;  %v294_v18 = vadd.f32 2.0, %v835_v2 }
  0x8a   : > { %v839_v7 = vpop.eup %838  ;;  %854 = vrcp.f32 %v353_v30  ;;  %v1459_v17 = vadd.f32 2.0, %v1453_v58  ;;  %v1461_v21 = vmul.f32 %v833_v36, %v293_v4  ;;  %v295_v28 = vadd.f32 2.0, %v837_v6 }
  0x8b   : > { %v841_v61 = vpop.eup %840  ;;  %856 = vrcp.f32 %v354_v3  ;;  %v1464_v39 = vadd.f32 2.0, %v1456_v5  ;;  %v1466_v8 = vmul.f32 %v835_v2, %v294_v18  ;;  %v296_v53 = vadd.f32 2.0, %v839_v7 }
  0x8c   : > { %858 = vrcp.f32 %v1459_v17  ;;  %v1470_v27 = vadd.f32 2.0, %v1461_v21  ;;  %v1472_v50 = vmul.f32 %v837_v6, %v295_v28  ;;  %v297_v23 = vadd.f32 2.0, %v841_v61 }
  0x8d   : > { %860 = vrcp.f32 %v1464_v39  ;;  %v1476_v54 = vadd.f32 2.0, %v1466_v8  ;;  %v1478_v12 = vmul.f32 %v839_v7, %v296_v53 }
  0x8e   : > { %v843_v19 = vpop.eup %842  ;;  %862 = vrcp.f32 %v1470_v27  ;;  %v1482_v48 = vadd.f32 2.0, %v1472_v50  ;;  %v1484_v55 = vmul.f32 %v841_v61, %v297_v23  ;;  %v1666_v23 = vld [vmem:[#allocation13_spill] sm:$0xff] }
  0x8f   : > { %v845_v13 = vpop.eup %844  ;;  %v411_v57 = vmul.f32 %v843_v19, %v347_v42  ;;  %864 = vrcp.f32 %v1476_v54  ;;  %v1488_v43 = vadd.f32 2.0, %v1478_v12 }
  0x90   : > { %v847_v40 = vpop.eup %846  ;;  %v412_v63 = vmul.f32 %v845_v13, %v348_v24  ;;  %866 = vrcp.f32 %v1482_v48  ;;  %v1492_v20 = vadd.f32 2.0, %v1484_v55 }
  0x91   : > { %v849_v22 = vpop.eup %848  ;;  %v443_v52 = vsub.f32 2.0, %v411_v57  ;;  %v413_v34 = vmul.f32 %v847_v40, %v349_v60  ;;  %868 = vrcp.f32 %v1488_v43 }
  0x92   : > { %v851_v47 = vpop.eup %850  ;;  %v444_v25 = vsub.f32 2.0, %v412_v63  ;;  %v414_v42 = vmul.f32 %v849_v22, %v350_v45  ;;  %870 = vrcp.f32 %v1492_v20 }
  0x93   : > { %v853_v32 = vpop.eup %852  ;;  %v475_v10 = vmul.f32 %v843_v19, %v443_v52  ;;  %v445_v16 = vsub.f32 2.0, %v413_v34  ;;  %v415_v56 = vmul.f32 %v851_v47, %v351_v31 }
  0x94   : > { %v855_v24 = vpop.eup %854  ;;  %v476_v0 = vmul.f32 %v845_v13, %v444_v25  ;;  %v446_v11 = vsub.f32 2.0, %v414_v42  ;;  %v416_v36 = vmul.f32 %v853_v32, %v352_v41  ;;  %v1669_v42 = vld [vmem:[#allocation16_spill] sm:$0xff] }
  0x95   : > { %v857_v46 = vpop.eup %856  ;;  %v507_v2 = vmul.f32 %v475_v10, %v1430_v37  ;;  %v477_v4 = vmul.f32 %v847_v40, %v445_v16  ;;  %v447_v60 = vsub.f32 2.0, %v415_v56  ;;  %v417_v6 = vmul.f32 %v855_v24, %v353_v30  ;;  %v1667_v37 = vld [vmem:[#allocation14_spill] sm:$0xff] }
  0x96   : > { %v859_v18 = vpop.eup %858  ;;  %v508_v45 = vmul.f32 %v476_v0, %v1432_v33  ;;  %v478_v7 = vmul.f32 %v849_v22, %v446_v11  ;;  %v448_v28 = vsub.f32 2.0, %v416_v36  ;;  %v418_v61 = vmul.f32 %v857_v46, %v354_v3  ;;  %v1668_v22 = vld [vmem:[#allocation15_spill] sm:$0xff]  ;;  %v1670_v0 = vld [vmem:[#allocation17_spill] sm:$0xff] }
  0x97   : > { %v861_v53 = vpop.eup %860  ;;  %v539_v31 = vmul.f32 %v507_v2, %v1666_v23  ;;  %v509_v19 = vmul.f32 %v477_v4, %v1435_v14  ;;  %v479_v41 = vmul.f32 %v851_v47, %v447_v60  ;;  %v449_v13 = vsub.f32 2.0, %v417_v6  ;;  %v1671_v2 = vld [vmem:[#allocation18_spill] sm:$0xff]  ;;  %v1672_v60 = vld [vmem:[#allocation19_spill] sm:$0xff] }
  0x98   : > { %v863_v57 = vpop.eup %862  ;;  %v540_v40 = vmul.f32 %v508_v45, %v1667_v37  ;;  %v510_v30 = vmul.f32 %v478_v7, %v1438_v62  ;;  %v480_v63 = vmul.f32 %v853_v32, %v448_v28  ;;  %v450_v52 = vsub.f32 2.0, %v418_v61 }
  0x99   : > { %v865_v33 = vpop.eup %864  ;;  %571 = vst [vmem:[%s1340_s17 + $0x88] sm:$0xff] %v539_v31  ;;  %v541_v3 = vmul.f32 %v509_v19, %v1668_v22  ;;  %v511_v34 = vmul.f32 %v479_v41, %v1441_v35  ;;  %v481_v25 = vmul.f32 %v855_v24, %v449_v13  ;;  %v419_v14 = vmul.f32 %v859_v18, %v1459_v17 }
  0x9a   : > { %v867_v47 = vpop.eup %866  ;;  %572 = vst [vmem:[%s1340_s17 + $0x90] sm:$0xff] %v540_v40  ;;  %v542_v10 = vmul.f32 %v510_v30, %v1669_v42  ;;  %v512_v62 = vmul.f32 %v480_v63, %v1444_v38  ;;  %v482_v16 = vmul.f32 %v857_v46, %v450_v52  ;;  %v420_v32 = vmul.f32 %v861_v53, %v1464_v39 }
  0x9b   : > { %v869_v56 = vpop.eup %868  ;;  %573 = vst [vmem:[%s1340_s17 + $0x98] sm:$0xff] %v541_v3  ;;  %v543_v11 = vmul.f32 %v511_v34, %v1670_v0  ;;  %v513_v35 = vmul.f32 %v481_v25, %v1447_v1  ;;  %v451_v24 = vsub.f32 2.0, %v419_v14  ;;  %v421_v17 = vmul.f32 %v863_v57, %v1470_v27  ;;  %v1673_v27 = vld [vmem:[#allocation20_spill] sm:$0xff] }
  0x9c   : > { %v871_v36 = vpop.eup %870  ;;  %574 = vst [vmem:[%s1340_s17 + $0xa0] sm:$0xff] %v542_v10  ;;  %v544_v4 = vmul.f32 %v512_v62, %v1671_v2  ;;  %v514_v38 = vmul.f32 %v482_v16, %v1450_v51  ;;  %v452_v46 = vsub.f32 2.0, %v420_v32  ;;  %v422_v39 = vmul.f32 %v865_v33, %v1476_v54 }
  0x9d   : > { %575 = vst [vmem:[%s1340_s17 + $0xa8] sm:$0xff] %v543_v11  ;;  %v545_v6 = vmul.f32 %v513_v35, %v1672_v60  ;;  %v483_v45 = vmul.f32 %v859_v18, %v451_v24  ;;  %v453_v7 = vsub.f32 2.0, %v421_v17  ;;  %v423_v1 = vmul.f32 %v867_v47, %v1482_v48 }
  0x9e   : > { %576 = vst [vmem:[%s1340_s17 + $0xb0] sm:$0xff] %v544_v4  ;;  %v546_v28 = vmul.f32 %v514_v38, %v1673_v27  ;;  %v484_v61 = vmul.f32 %v861_v53, %v452_v46  ;;  %v454_v23 = vsub.f32 2.0, %v422_v39  ;;  %v424_v31 = vmul.f32 %v869_v56, %v1488_v43 }
  0x9f   : > { %577 = vst [vmem:[%s1340_s17 + $0xb8] sm:$0xff] %v545_v6  ;;  %v515_v51 = vmul.f32 %v483_v45, %v1453_v58  ;;  %v485_v54 = vmul.f32 %v863_v57, %v453_v7  ;;  %v455_v19 = vsub.f32 2.0, %v423_v1  ;;  %v425_v41 = vmul.f32 %v871_v36, %v1492_v20 }
  0xa0   : > { %578 = vst [vmem:[%s1340_s17 + $0xc0] sm:$0xff] %v546_v28  ;;  %v516_v48 = vmul.f32 %v484_v61, %v1456_v5  ;;  %v486_v18 = vmul.f32 %v865_v33, %v454_v23  ;;  %v456_v13 = vsub.f32 2.0, %v424_v31 }
  0xa1   : > { %v547_v53 = vmul.f32 %v515_v51, %v1655_v9  ;;  %v517_v43 = vmul.f32 %v485_v54, %v1461_v21  ;;  %v487_v37 = vmul.f32 %v867_v47, %v455_v19  ;;  %v457_v40 = vsub.f32 2.0, %v425_v41 }
  0xa2   : > { %v548_v58 = vmul.f32 %v516_v48, %v1383_v29  ;;  %v518_v20 = vmul.f32 %v486_v18, %v1466_v8  ;;  %v488_v57 = vmul.f32 %v869_v56, %v456_v13 }
  0xa3   : > { %579 = vst [vmem:[%s1340_s17 + $0xc8] sm:$0xff] %v547_v53  ;;  %v549_v5 = vmul.f32 %v517_v43, %v1390_v26  ;;  %v519_v30 = vmul.f32 %v487_v37, %v1472_v50  ;;  %v489_v63 = vmul.f32 %v871_v36, %v457_v40 }
  0xa4   : > { %580 = vst [vmem:[%s1340_s17 + $0xd0] sm:$0xff] %v548_v58  ;;  %v550_v9 = vmul.f32 %v518_v20, %v1393_v49  ;;  %v520_v29 = vmul.f32 %v488_v57, %v1478_v12 }
  0xa5   : > { %581 = vst [vmem:[%s1340_s17 + $0xd8] sm:$0xff] %v549_v5  ;;  %v551_v21 = vmul.f32 %v519_v30, %v1402_v15  ;;  %v521_v8 = vmul.f32 %v489_v63, %v1484_v55 }
  0xa6   : > { %582 = vst [vmem:[%s1340_s17 + $0xe0] sm:$0xff] %v550_v9  ;;  %v552_v26 = vmul.f32 %v520_v29, %v1409_v44 }
  0xa7   : > { %583 = vst [vmem:[%s1340_s17 + $0xe8] sm:$0xff] %v551_v21  ;;  %v553_v49 = vmul.f32 %v521_v8, %v1417_v59 }
  0xa8   : > { %584 = vst [vmem:[%s1340_s17 + $0xf0] sm:$0xff] %v552_v26 }
  0xa9   : > { %585 = vst [vmem:[%s1340_s17 + $0xf8] sm:$0xff] %v553_v49 }
  0xaa   : > { %915 = shalt.err (!%p912_p2)
}
  0xab   : > { %s916_s13 = scalar_lea.hbm %s1549_s10, 4096  ;;  %s920_s20 = scalar_lea.hbm %s1600_s1, 8192 }
  0xac   : > { %p917_p4 = scmp.ne.s32.totalorder %s1549_s10, %s916_s13  ;;  %p921_p9 = scmp.lt.u32.totalorder %s1549_s10, %s1600_s1 }
  0xad   : > { %p922_p1 = scmp.lt.u32.totalorder %s920_s20, %s916_s13  ;;  %p924_p6 = scmp.lt.u32.totalorder %s916_s13, %s1549_s10 }
  0xae   : > { %p918_p5 = pnand %p917_p4, %p1674_p11 }
  0xaf   : > { %p923_p3 = por %p922_p1, %p921_p9 }
  0xb0   : > { %p919_p7 = pneg %p918_p5 }
  0xb1   : > { %p925_p12 = por %p924_p6, %p923_p3 }
  0xb3   : > { %p926_p13 = pnand %p925_p12, %p919_p7 }
  0xb5   : > { %929 = shalt.err (!%p926_p13)
}
  0xb6   : > { %s974_s24 = smov 1024   ;;  %s975_s26 = smov 64  }
  0xb7   : > { %696 = dma.vmem_to_hbm [thread:$0]  (%p1674_p11), %s1551_s27, 4096, %s1549_s10, %s587_s2, %s974_s24, %s974_s24, %s975_s26  }
  0xb8 PF: > { %s616_s30 = sand.u32 1, %s956_s6   ;;  %p1675_p8 = scmp.ne.s32.totalorder %s1623_s19, 0 }
  0xb9   : > { %p1676_p10 = scmp.ge.s32.totalorder %s968_s9, 2  ;;  %s617_s17 = scalar_lea.sflag [#allocation4], %s616_s30 }
  0xbb   : > { %p703_p0 = pnand %p1676_p10, %p1675_p8 }
  0xbd   : > { %951 = dma.done.wait (!%p703_p0), %s617_s17, 4096  }
  0xbe   : > { %953 = vsyncadd (!%p703_p0), %s617_s17, 4294963200  ;;  %p14_p2 = scmp.ge.s32.totalorder %s1011_s12, 4   ;;  %s1677_s6 = smov %s960_s7 }
  0xbf   : > { %s1678_s7 = smov %s964_s8  ;;  %s1679_s8 = smov %s1023_s15 }
  0xc0   : > { %s1680_s9 = smov %s1011_s12  ;;  %16 = sbr.rel (!%p14_p2) target bundleno = 5 (0x5), region = 69 }
  0xc7   :  { %622 = vsyncpa [#allocation3], 1 }
  0xc8   :  { %624 = vsyncpa [#allocation3 + $0x1], 1 }
  0xc9   :  { %625 = vsyncpa [#allocation4], 1 }
  0xca   :  { %627 = vsyncpa [#allocation4 + $0x1], 1 }

</bundles_post_ra>
